<compile_context>
chip_gen: v6e
topology: v6e:2x2x1
jax: 0.10.0
libtpu: 0.0.40
codegen_flags: <defaults>
</compile_context>

<pallas_src>
import functools

import jax
import jax.numpy as jnp
from jax.experimental import pallas as pl
from jax.experimental.pallas import tpu as pltpu


def mha_kernel(x_ref, wq_ref, bq_ref, wk_ref, bk_ref, wv_ref, bv_ref,
               wo_ref, bo_ref, out_ref, *, num_heads):
    S, H = x_ref.shape
    x = x_ref[...]                                        # (S, H) f32

    # Head-batched view of the activations (single hoisted broadcast).
    xh = jnp.broadcast_to(x, (num_heads, S, H))           # (nh, S, H)

    # Projections as head-batched matmuls against wrapper-permuted weights
    # (nh, H, hd): no in-kernel transposes of weights or activations.
    q = jnp.einsum("hsk,hkd->hsd", xh, wq_ref[...],
                   preferred_element_type=jnp.float32) + bq_ref[...]
    k = jnp.einsum("hsk,hkd->hsd", xh, wk_ref[...],
                   preferred_element_type=jnp.float32) + bk_ref[...]
    v = jnp.einsum("hsk,hkd->hsd", xh, wv_ref[...],
                   preferred_element_type=jnp.float32) + bv_ref[...]

    # Scaled dot-product attention for all heads at once.
    # (1/sqrt(head_dim) is already folded into Wq/bq wrapper-side.)
    s = jnp.einsum("hqd,hkd->hqk", q, k,
                   preferred_element_type=jnp.float32)    # (nh, S, S)
    s = s - jnp.max(s, axis=-1, keepdims=True)            # stable softmax
    p = jnp.exp(s)
    inv = pl.reciprocal(jnp.sum(p, axis=-1, keepdims=True), approx=True)
    attn = p * inv

    o_h = jnp.einsum("hqk,hkd->hqd", attn, v,
                     preferred_element_type=jnp.float32)  # (nh, S, hd)

    # Output projection fused with the head concatenation:
    # per-head contraction against (nh, hd, H), then reduce over heads.
    o = jnp.einsum("hsd,hdo->hso", o_h, wo_ref[...],
                   preferred_element_type=jnp.float32)    # (nh, S, H)
    out = jnp.sum(o, axis=0) + bo_ref[...]                # (S, H) + (1, H)
    out_ref[...] = out.astype(out_ref.dtype)


def multi_head_attention(x, params, num_heads):
    B, S, H = x.shape
    hd = H // num_heads
    wq, bq, wk, bk, wv, bv, wo, bo = params

    scale = 1.0 / jnp.sqrt(jnp.float32(hd))

    def to_heads(w, b):
        # PyTorch Linear: y = x @ w.T + b with w:(out,in). Pre-transpose and split
        # the `out` dim into (num_heads, head_dim) so the kernel computes x @ W
        # directly in head-batched layout.
        w_h = w.T.reshape(H, num_heads, hd).transpose(1, 0, 2)   # (nh, H, hd)
        b_h = b.reshape(num_heads, 1, hd)                        # (nh, 1, hd)
        return w_h, b_h

    # Fold the softmax scale into the Q projection (free, wrapper-side).
    wq_h, bq_h = to_heads(wq * scale, bq * scale)
    wk_h, bk_h = to_heads(wk, bk)
    wv_h, bv_h = to_heads(wv, bv)
    wo_h = wo.T.reshape(num_heads, hd, H)                        # (nh, hd, H)
    bo_2 = bo.reshape(1, H)

    # Fuse batch into the row dimension; one sequence (row tile) per grid step.
    x2 = x.reshape(B * S, H)

    # Weights: constant index_map -> fetched once, resident across the grid.
    full = lambda shape: pl.BlockSpec(shape, lambda b: (0,) * len(shape))

    out2 = pl.pallas_call(
        functools.partial(mha_kernel, num_heads=num_heads),
        out_shape=jax.ShapeDtypeStruct((B * S, H), x.dtype),
        grid_spec=pltpu.PrefetchScalarGridSpec(
            num_scalar_prefetch=0,
            grid=(B,),
            in_specs=[
                pl.BlockSpec((S, H), lambda b: (b, 0)),              # x rows of batch b
                full((num_heads, H, hd)), full((num_heads, 1, hd)),  # Wq, bq (scaled)
                full((num_heads, H, hd)), full((num_heads, 1, hd)),  # Wk, bk
                full((num_heads, H, hd)), full((num_heads, 1, hd)),  # Wv, bv
                full((num_heads, hd, H)), full((1, H)),              # Wo, bo
            ],
            out_specs=pl.BlockSpec((S, H), lambda b: (b, 0)),
        ),
        compiler_params=pltpu.CompilerParams(
            dimension_semantics=("parallel",)),
    )(x2, wq_h, bq_h, wk_h, bk_h, wv_h, bv_h, wo_h, bo_2)

    return out2.reshape(B, S, H)


def init_params(key, hidden_dim):
    # Deterministic synthetic parameters (PyTorch Linear shapes: W [out,in], b [out]).
    keys = jax.random.split(key, 8)
    scale = 1.0 / jnp.sqrt(jnp.float32(hidden_dim))

    def lin(kw, kb):
        w = jax.random.uniform(kw, (hidden_dim, hidden_dim),
                               jnp.float32, -scale, scale)
        b = jax.random.uniform(kb, (hidden_dim,), jnp.float32, -scale, scale)
        return w, b

    wq, bq = lin(keys[0], keys[1])
    wk, bk = lin(keys[2], keys[3])
    wv, bv = lin(keys[4], keys[5])
    wo, bo = lin(keys[6], keys[7])
    return (wq, bq, wk, bk, wv, bv, wo, bo)


def reference_mha(x, params, num_heads):
    # Pure-JAX reference mirroring the PyTorch forward exactly.
    wq, bq, wk, bk, wv, bv, wo, bo = params
    B, S, H = x.shape
    hd = H // num_heads
    q = (x @ wq.T + bq).reshape(B, S, num_heads, hd).transpose(0, 2, 1, 3)
    k = (x @ wk.T + bk).reshape(B, S, num_heads, hd).transpose(0, 2, 1, 3)
    v = (x @ wv.T + bv).reshape(B, S, num_heads, hd).transpose(0, 2, 1, 3)
    scores = jnp.einsum("bhqd,bhkd->bhqk", q, k) / jnp.sqrt(jnp.float32(hd))
    attn = jax.nn.softmax(scores, axis=-1)
    out = jnp.einsum("bhqk,bhkd->bhqd", attn, v)
    out = out.transpose(0, 2, 1, 3).reshape(B, S, H)
    return out @ wo.T + bo


if __name__ == "__main__":
    B, S, H = 2, 8, 32
    NUM_HEADS = 8

    key = jax.random.PRNGKey(0)
    kx, kp = jax.random.split(key)
    x = jax.random.normal(kx, (B, S, H), jnp.float32)
    params = init_params(kp, H)

    out = multi_head_attention(x, params, NUM_HEADS)
    out = jax.block_until_ready(out)

    ref = reference_mha(x, params, NUM_HEADS)
    assert out.shape == (B, S, H)
    # Tolerance covers the EUP approximate-reciprocal softmax normalization.
    assert jnp.allclose(out, ref, atol=2e-3, rtol=2e-3), "mismatch vs reference"

    print("KERNEL_OK")
</pallas_src>

<mosaic_0001>
module attributes {stable_mosaic.version = 11 : i64} {
  func.func @mha_kernel(%arg0: i32, %arg1: memref<8x32xf32, #tpu.memory_space<vmem>>, %arg2: memref<8x32x4xf32, #tpu.memory_space<vmem>>, %arg3: memref<8x1x4xf32, #tpu.memory_space<vmem>>, %arg4: memref<8x32x4xf32, #tpu.memory_space<vmem>>, %arg5: memref<8x1x4xf32, #tpu.memory_space<vmem>>, %arg6: memref<8x32x4xf32, #tpu.memory_space<vmem>>, %arg7: memref<8x1x4xf32, #tpu.memory_space<vmem>>, %arg8: memref<8x4x32xf32, #tpu.memory_space<vmem>>, %arg9: memref<1x32xf32, #tpu.memory_space<vmem>>, %arg10: memref<8x32xf32, #tpu.memory_space<vmem>>) attributes {dimension_semantics = [#tpu.dimension_semantics<parallel>], iteration_bounds = array<i64: 2>, scalar_prefetch = 0 : i64, scratch_operands = 0 : i64, tpu.core_type = #tpu.core_type<tc>, window_params = [{transform_indices = @transform_0, window_bounds = array<i64: 8, 32>}, {pipeline_mode = #tpu.pipeline_mode<synchronous>, transform_indices = @transform_1, window_bounds = array<i64: 8, 32, 4>}, {pipeline_mode = #tpu.pipeline_mode<synchronous>, transform_indices = @transform_2, window_bounds = array<i64: 8, 1, 4>}, {pipeline_mode = #tpu.pipeline_mode<synchronous>, transform_indices = @transform_3, window_bounds = array<i64: 8, 32, 4>}, {pipeline_mode = #tpu.pipeline_mode<synchronous>, transform_indices = @transform_4, window_bounds = array<i64: 8, 1, 4>}, {pipeline_mode = #tpu.pipeline_mode<synchronous>, transform_indices = @transform_5, window_bounds = array<i64: 8, 32, 4>}, {pipeline_mode = #tpu.pipeline_mode<synchronous>, transform_indices = @transform_6, window_bounds = array<i64: 8, 1, 4>}, {pipeline_mode = #tpu.pipeline_mode<synchronous>, transform_indices = @transform_7, window_bounds = array<i64: 8, 4, 32>}, {pipeline_mode = #tpu.pipeline_mode<synchronous>, transform_indices = @transform_8, window_bounds = array<i64: 1, 32>}, {transform_indices = @transform_9, window_bounds = array<i64: 8, 32>}]} {
    %c0 = arith.constant 0 : index
    %c0_0 = arith.constant 0 : index
    %0 = vector.load %arg1[%c0, %c0_0] : memref<8x32xf32, #tpu.memory_space<vmem>>, vector<8x32xf32>
    %1 = vector.shape_cast %0 : vector<8x32xf32> to vector<1x8x32xf32>
    %2 = vector.broadcast %1 : vector<1x8x32xf32> to vector<8x8x32xf32>
    %c0_1 = arith.constant 0 : index
    %c0_2 = arith.constant 0 : index
    %c0_3 = arith.constant 0 : index
    %3 = vector.load %arg2[%c0_1, %c0_2, %c0_3] : memref<8x32x4xf32, #tpu.memory_space<vmem>>, vector<8x32x4xf32>
    "tpu.trace_start"() <{level = 10 : i32, message = "hsk,hkd->hsd"}> : () -> ()
    %cst = arith.constant dense<0.000000e+00> : vector<8x8x4xf32>
    %4 = tpu.matmul %2, %3, %cst {dimension_numbers = #tpu.dot_dimension_numbers<[2], [1], [1], [2], [0, 0, 0, 1, 1, 2], [0], [0]>} : vector<8x8x32xf32>, vector<8x32x4xf32>, vector<8x8x4xf32> -> vector<8x8x4xf32>
    "tpu.trace_stop"() : () -> ()
    %c0_4 = arith.constant 0 : index
    %c0_5 = arith.constant 0 : index
    %c0_6 = arith.constant 0 : index
    %5 = vector.load %arg3[%c0_4, %c0_5, %c0_6] : memref<8x1x4xf32, #tpu.memory_space<vmem>>, vector<8x1x4xf32>
    %6 = vector.broadcast %5 : vector<8x1x4xf32> to vector<8x8x4xf32>
    %7 = arith.addf %4, %6 : vector<8x8x4xf32>
    %c0_7 = arith.constant 0 : index
    %c0_8 = arith.constant 0 : index
    %c0_9 = arith.constant 0 : index
    %8 = vector.load %arg4[%c0_7, %c0_8, %c0_9] : memref<8x32x4xf32, #tpu.memory_space<vmem>>, vector<8x32x4xf32>
    "tpu.trace_start"() <{level = 10 : i32, message = "hsk,hkd->hsd"}> : () -> ()
    %cst_10 = arith.constant dense<0.000000e+00> : vector<8x8x4xf32>
    %9 = tpu.matmul %2, %8, %cst_10 {dimension_numbers = #tpu.dot_dimension_numbers<[2], [1], [1], [2], [0, 0, 0, 1, 1, 2], [0], [0]>} : vector<8x8x32xf32>, vector<8x32x4xf32>, vector<8x8x4xf32> -> vector<8x8x4xf32>
    "tpu.trace_stop"() : () -> ()
    %c0_11 = arith.constant 0 : index
    %c0_12 = arith.constant 0 : index
    %c0_13 = arith.constant 0 : index
    %10 = vector.load %arg5[%c0_11, %c0_12, %c0_13] : memref<8x1x4xf32, #tpu.memory_space<vmem>>, vector<8x1x4xf32>
    %11 = vector.broadcast %10 : vector<8x1x4xf32> to vector<8x8x4xf32>
    %12 = arith.addf %9, %11 : vector<8x8x4xf32>
    %c0_14 = arith.constant 0 : index
    %c0_15 = arith.constant 0 : index
    %c0_16 = arith.constant 0 : index
    %13 = vector.load %arg6[%c0_14, %c0_15, %c0_16] : memref<8x32x4xf32, #tpu.memory_space<vmem>>, vector<8x32x4xf32>
    "tpu.trace_start"() <{level = 10 : i32, message = "hsk,hkd->hsd"}> : () -> ()
    %cst_17 = arith.constant dense<0.000000e+00> : vector<8x8x4xf32>
    %14 = tpu.matmul %2, %13, %cst_17 {dimension_numbers = #tpu.dot_dimension_numbers<[2], [1], [1], [2], [0, 0, 0, 1, 1, 2], [0], [0]>} : vector<8x8x32xf32>, vector<8x32x4xf32>, vector<8x8x4xf32> -> vector<8x8x4xf32>
    "tpu.trace_stop"() : () -> ()
    %c0_18 = arith.constant 0 : index
    %c0_19 = arith.constant 0 : index
    %c0_20 = arith.constant 0 : index
    %15 = vector.load %arg7[%c0_18, %c0_19, %c0_20] : memref<8x1x4xf32, #tpu.memory_space<vmem>>, vector<8x1x4xf32>
    %16 = vector.broadcast %15 : vector<8x1x4xf32> to vector<8x8x4xf32>
    %17 = arith.addf %14, %16 : vector<8x8x4xf32>
    "tpu.trace_start"() <{level = 10 : i32, message = "hqd,hkd->hqk"}> : () -> ()
    %cst_21 = arith.constant dense<0.000000e+00> : vector<8x8x8xf32>
    %18 = tpu.matmul %7, %12, %cst_21 {dimension_numbers = #tpu.dot_dimension_numbers<[2], [2], [1], [1], [0, 0, 0, 1, 1, 1], [0], [0]>} : vector<8x8x4xf32>, vector<8x8x4xf32>, vector<8x8x8xf32> -> vector<8x8x8xf32>
    "tpu.trace_stop"() : () -> ()
    %cst_22 = arith.constant dense<0xFF800000> : vector<8x8xf32>
    %19 = vector.multi_reduction <maximumf>, %18, %cst_22 [2] : vector<8x8x8xf32> to vector<8x8xf32>
    %20 = vector.shape_cast %19 : vector<8x8xf32> to vector<8x8x1xf32>
    %21 = vector.broadcast %20 : vector<8x8x1xf32> to vector<8x8x8xf32>
    %22 = arith.subf %18, %21 : vector<8x8x8xf32>
    %23 = math.exp %22 : vector<8x8x8xf32>
    %cst_23 = arith.constant dense<0.000000e+00> : vector<8x8xf32>
    %24 = vector.multi_reduction <add>, %23, %cst_23 [2] : vector<8x8x8xf32> to vector<8x8xf32>
    %25 = vector.shape_cast %24 : vector<8x8xf32> to vector<8x8x1xf32>
    %26 = tpu.reciprocal %25 {approx = true} : vector<8x8x1xf32> -> vector<8x8x1xf32>
    %27 = vector.broadcast %26 : vector<8x8x1xf32> to vector<8x8x8xf32>
    %28 = arith.mulf %23, %27 : vector<8x8x8xf32>
    "tpu.trace_start"() <{level = 10 : i32, message = "hqk,hkd->hqd"}> : () -> ()
    %cst_24 = arith.constant dense<0.000000e+00> : vector<8x8x4xf32>
    %29 = tpu.matmul %28, %17, %cst_24 {dimension_numbers = #tpu.dot_dimension_numbers<[2], [1], [1], [2], [0, 0, 0, 1, 1, 2], [0], [0]>} : vector<8x8x8xf32>, vector<8x8x4xf32>, vector<8x8x4xf32> -> vector<8x8x4xf32>
    "tpu.trace_stop"() : () -> ()
    %c0_25 = arith.constant 0 : index
    %c0_26 = arith.constant 0 : index
    %c0_27 = arith.constant 0 : index
    %30 = vector.load %arg8[%c0_25, %c0_26, %c0_27] : memref<8x4x32xf32, #tpu.memory_space<vmem>>, vector<8x4x32xf32>
    "tpu.trace_start"() <{level = 10 : i32, message = "hsd,hdo->hso"}> : () -> ()
    %cst_28 = arith.constant dense<0.000000e+00> : vector<8x8x32xf32>
    %31 = tpu.matmul %29, %30, %cst_28 {dimension_numbers = #tpu.dot_dimension_numbers<[2], [1], [1], [2], [0, 0, 0, 1, 1, 2], [0], [0]>} : vector<8x8x4xf32>, vector<8x4x32xf32>, vector<8x8x32xf32> -> vector<8x8x32xf32>
    "tpu.trace_stop"() : () -> ()
    %cst_29 = arith.constant dense<0.000000e+00> : vector<8x32xf32>
    %32 = vector.multi_reduction <add>, %31, %cst_29 [0] : vector<8x8x32xf32> to vector<8x32xf32>
    %c0_30 = arith.constant 0 : index
    %c0_31 = arith.constant 0 : index
    %33 = vector.load %arg9[%c0_30, %c0_31] : memref<1x32xf32, #tpu.memory_space<vmem>>, vector<1x32xf32>
    %34 = vector.broadcast %33 : vector<1x32xf32> to vector<8x32xf32>
    %35 = arith.addf %32, %34 : vector<8x32xf32>
    %c0_32 = arith.constant 0 : index
    %c0_33 = arith.constant 0 : index
    %36 = vector.load %arg10[%c0_32, %c0_33] : memref<8x32xf32, #tpu.memory_space<vmem>>, vector<8x32xf32>
    tpu.vector_store %arg10[%c0_32, %c0_33], %35 {strides = array<i32>} : memref<8x32xf32, #tpu.memory_space<vmem>>, vector<8x32xf32>,
    return
  }
  func.func @transform_0(%arg0: i32) -> (i32, i32) {
    %c0_i32 = arith.constant 0 : i32
    %c0_i32_0 = arith.constant 0 : i32
    return %arg0, %c0_i32 : i32, i32
  }
  func.func @transform_1(%arg0: i32) -> (i32, i32, i32) {
    %c0_i32 = arith.constant 0 : i32
    %c0_i32_0 = arith.constant 0 : i32
    %c0_i32_1 = arith.constant 0 : i32
    %c0_i32_2 = arith.constant 0 : i32
    return %c0_i32, %c0_i32_0, %c0_i32_1 : i32, i32, i32
  }
  func.func @transform_2(%arg0: i32) -> (i32, i32, i32) {
    %c0_i32 = arith.constant 0 : i32
    %c0_i32_0 = arith.constant 0 : i32
    %c0_i32_1 = arith.constant 0 : i32
    %c0_i32_2 = arith.constant 0 : i32
    return %c0_i32, %c0_i32_0, %c0_i32_1 : i32, i32, i32
  }
  func.func @transform_3(%arg0: i32) -> (i32, i32, i32) {
    %c0_i32 = arith.constant 0 : i32
    %c0_i32_0 = arith.constant 0 : i32
    %c0_i32_1 = arith.constant 0 : i32
    %c0_i32_2 = arith.constant 0 : i32
    return %c0_i32, %c0_i32_0, %c0_i32_1 : i32, i32, i32
  }
  func.func @transform_4(%arg0: i32) -> (i32, i32, i32) {
    %c0_i32 = arith.constant 0 : i32
    %c0_i32_0 = arith.constant 0 : i32
    %c0_i32_1 = arith.constant 0 : i32
    %c0_i32_2 = arith.constant 0 : i32
    return %c0_i32, %c0_i32_0, %c0_i32_1 : i32, i32, i32
  }
  func.func @transform_5(%arg0: i32) -> (i32, i32, i32) {
    %c0_i32 = arith.constant 0 : i32
    %c0_i32_0 = arith.constant 0 : i32
    %c0_i32_1 = arith.constant 0 : i32
    %c0_i32_2 = arith.constant 0 : i32
    return %c0_i32, %c0_i32_0, %c0_i32_1 : i32, i32, i32
  }
  func.func @transform_6(%arg0: i32) -> (i32, i32, i32) {
    %c0_i32 = arith.constant 0 : i32
    %c0_i32_0 = arith.constant 0 : i32
    %c0_i32_1 = arith.constant 0 : i32
    %c0_i32_2 = arith.constant 0 : i32
    return %c0_i32, %c0_i32_0, %c0_i32_1 : i32, i32, i32
  }
  func.func @transform_7(%arg0: i32) -> (i32, i32, i32) {
    %c0_i32 = arith.constant 0 : i32
    %c0_i32_0 = arith.constant 0 : i32
    %c0_i32_1 = arith.constant 0 : i32
    %c0_i32_2 = arith.constant 0 : i32
    return %c0_i32, %c0_i32_0, %c0_i32_1 : i32, i32, i32
  }
  func.func @transform_8(%arg0: i32) -> (i32, i32) {
    %c0_i32 = arith.constant 0 : i32
    %c0_i32_0 = arith.constant 0 : i32
    %c0_i32_1 = arith.constant 0 : i32
    return %c0_i32, %c0_i32_0 : i32, i32
  }
  func.func @transform_9(%arg0: i32) -> (i32, i32) {
    %c0_i32 = arith.constant 0 : i32
    %c0_i32_0 = arith.constant 0 : i32
    return %arg0, %c0_i32 : i32, i32
  }
}

</mosaic_0001>

<bundles_post_ra>
// kernel: tpu_custom_call.1
= control target key start
LH: loop header
LB: loop body
LE: loop exit
PB: predicated region body
PF: predicated region fallthrough
CT: control target
= control target key end

     0   :  { %14 = vsyncpa [#allocation3], 0  ;;  %s5957_s0 = inlined_call_operand.vmem [shape: f32[16,32], index: 0, kind: input, shape index: {}]   ;;  %s5958_s1 = inlined_call_operand.vmem [shape: f32[8,32,4], index: 1, kind: input, shape index: {}]   ;;  %s5959_s2 = inlined_call_operand.vmem [shape: f32[8,1,4], index: 2, kind: input, shape index: {}]   ;;  %s5960_s3 = inlined_call_operand.vmem [shape: f32[8,32,4], index: 3, kind: input, shape index: {}]   ;;  %s5961_s4 = inlined_call_operand.vmem [shape: f32[8,1,4], index: 4, kind: input, shape index: {}]   ;;  %s5962_s5 = inlined_call_operand.vmem [shape: f32[8,32,4], index: 5, kind: input, shape index: {}]   ;;  %s5963_s6 = inlined_call_operand.vmem [shape: f32[8,1,4], index: 6, kind: input, shape index: {}]   ;;  %s5964_s7 = inlined_call_operand.vmem [shape: f32[8,4,32], index: 7, kind: input, shape index: {}]   ;;  %s5965_s8 = inlined_call_operand.vmem [shape: f32[1,32], index: 8, kind: input, shape index: {}]   ;;  %s5966_s9 = inlined_call_operand.hbm [shape: f32[16,32], index: 9, kind: output, shape index: {}]  }
   0x1   :  { %16 = vsyncpa [#allocation3 + $0x1], 0  ;;  %s5112_s30 = smov 0   ;;  %s5114_s10 = smov 0  }
   0x2   :  { %s5116_s11 = smov 0   ;;  %s5118_s12 = smov 0  }
   0x3 LB: > { %s5133_s13 = sadd.s32 4294967295, %s5057_s12   ;;  %s4273_s14 = sadd.s32 4294967294, %s5057_s12   ;;  %s5057_s12 = sphi %s5118_s12, %s5972_s12   ;;  %s5053_s11 = sphi %s5116_s11, %s5971_s11   ;;  %s5049_s10 = sphi %s5114_s10, %s5970_s10   ;;  %s5045_s30 = sphi %s5112_s30, %s5969_s30  }
   0x4   : > { %s5137_s15 = sadd.s32 1, %s5057_s12   ;;  %s223_s16 = sadd.s32 1, %s5053_s11 }
   0x5   : > { %s220_s17 = ssub.s32 %s5057_s12, %s5137_s15  ;;  %p233_p0 = scmp.ne.s32.totalorder %s5053_s11, %s5049_s10 }
   0x6   : > { %p221_p1 = scmp.eq.s32.totalorder %s220_s17, 0  ;;  %p234_p2 = scmp.eq.s32.totalorder %s5133_s13, 1 }
   0x7   : > { %p239_p3 = scmp.ne.s32.totalorder %s5049_s10, %s5045_s30  ;;  %p240_p4 = scmp.eq.s32.totalorder %s4273_s14, 1 }
   0x8   : > { %s5148_s18 = scalar_select %p221_p1, %s5053_s11, %s223_s16  }
   0x9   : > { %p5150_p5 = por %p234_p2, %p233_p0  ;;  %p5154_p6 = por %p240_p4, %p239_p3 }
   0xa   : > { %p4276_p7 = scmp.ge.s32.totalorder %s5057_s12, 1  ;;  %p289_p8 = scmp.lt.s32.totalorder %s5057_s12, 3 }
   0xc   : > { %p290_p9 = pnand %p4276_p7, %p289_p8 }
   0xd   : > { %p324_p10 = scmp.lt.s32.totalorder (!%p290_p9), %s5133_s13, 1  ;;  %s5061_s17 = smov (!%p290_p9), [#allocation2]  }
   0xe   : > { %293 = sbr.rel (%p290_p9) target bundleno = 1209 (0x4b9), region = 56  ;;  %s5001_s21 = sshll.u32 (!%p290_p9), %s5061_s17, 4  ;;  %s5002_s21 = int_to_ptr.vmem [resolvable:$false] %s5001_s21 }
  0x13   : > { %v332_v0 = vld [vmem:[%s5958_s1 + $0x18] sm:$0xff]  ;;  %v5059_v2 = vmov 0.0   ;;  %v331_v3 = vld [vmem:[%s5958_s1 + $0x10] sm:$0xff]  ;;  %s325_s29 = scalar_select %p324_p10, %s5133_s13, 1  ;;  %v330_v5 = vld [vmem:[%s5958_s1 + $0x8] sm:$0xff]  ;;  %vm417_vm0 = vcmask 261120  }
  0x14   : > { %v336_v1 = vld [vmem:[%s5958_s1 + $0x38] sm:$0xff]  ;;  %4540 = vmatprep.subr.mxu0 %v5059_v2  ;;  %4551 = vmatprep.subr.mxu1 %v5059_v2  ;;  %v335_v4 = vld [vmem:[%s5958_s1 + $0x30] sm:$0xff]  ;;  %v334_v6 = vld [vmem:[%s5958_s1 + $0x28] sm:$0xff]  ;;  %vm5060_vm1 = vmmov 0   ;;  %vm2277_vm2 = vcmask 31744   ;;  %vm2886_vm3 = vcmask 64512  }
  0x15   : > { %4541 = vmatpush3.msra.mxu0 %v332_v0  ;;  %4552 = vmatpush3.msra.mxu1 %v336_v1  ;;  %s4278_s22 = sshll.u32 %s325_s29, 3  ;;  %v329_v7 = vld [vmem:[%s5958_s1] sm:$0xff]  ;;  %v340_v10 = vld [vmem:[%s5958_s1 + $0x58] sm:$0xff]  ;;  %v339_v12 = vld [vmem:[%s5958_s1 + $0x50] sm:$0xff]  ;;  %vm3570_vm4 = vcmask 1043456   ;;  %s321_s29 = sand.u32 1, %s5049_s10  }
  0x16   : > { %4542 = vmatprep.subr.mxu0 %v5059_v2  ;;  %4553 = vmatprep.subr.mxu1 %v5059_v2  ;;  %s327_s27 = scalar_lea.vmem %s5957_s0, %s4278_s22  ;;  %v333_v8 = vld [vmem:[%s5958_s1 + $0x20] sm:$0xff]  ;;  %v344_v11 = vld [vmem:[%s5958_s1 + $0x78] sm:$0xff]  ;;  %v343_v13 = vld [vmem:[%s5958_s1 + $0x70] sm:$0xff]  ;;  %s4277_s16 = sshll.u32 %s321_s29, 3 }
  0x17   : > { %4543 = vmatpush3.msra.mxu0 %v331_v3  ;;  %4554 = vmatpush3.msra.mxu1 %v335_v4  ;;  %v5195_v9 = vld [vmem:[%s327_s27] sm:$0xff]  ;;  %v338_v14 = vld [vmem:[%s5958_s1 + $0x48] sm:$0xff]  ;;  %v348_v18 = vld [vmem:[%s5958_s1 + $0x98] sm:$0xff]  ;;  %s4369_s22 = sshll.u32 %s5133_s13, 7  ;;  %s323_s23 = scalar_lea.vmem [#allocation2], %s4277_s16 }
  0x18   : > { %4544 = vmatprep.subr.mxu0 %v5059_v2  ;;  %4555 = vmatprep.subr.mxu1 %v5059_v2  ;;  %v342_v15 = vld [vmem:[%s5958_s1 + $0x68] sm:$0xff]  ;;  %v337_v16 = vld [vmem:[%s5958_s1 + $0x40] sm:$0xff]  ;;  %v352_v19 = vld [vmem:[%s5958_s1 + $0xb8] sm:$0xff]  ;;  %s4214_s24 = sshll.u32 %s323_s23, 4  ;;  %s4212_s27 = scalar_lea.hbm %s5966_s9, %s4369_s22  ;;  %s4215_s24 = int_to_ptr.vmem [resolvable:$true] %s4214_s24 }
  0x19   : > { %4545 = vmatpush3.msra.mxu0 %v330_v5  ;;  %4556 = vmatpush3.msra.mxu1 %v334_v6  ;;  %v341_v17 = vld [vmem:[%s5958_s1 + $0x60] sm:$0xff]  ;;  %v347_v20 = vld [vmem:[%s5958_s1 + $0x90] sm:$0xff]  ;;  %v346_v22 = vld [vmem:[%s5958_s1 + $0x88] sm:$0xff]  ;;  %s4201_s28 = scalar_lea.sflag [#allocation3], %s321_s29  ;;  %s4997_s14 = scalar_lea.vmem %s4215_s24, 128 }
  0x1a   : > { %4546 = vmatprep.subr.mxu0 %v5059_v2  ;;  %4557 = vmatprep.subr.mxu1 %v5059_v2  ;;  %v351_v21 = vld [vmem:[%s5958_s1 + $0xb0] sm:$0xff]  ;;  %v350_v23 = vld [vmem:[%s5958_s1 + $0xa8] sm:$0xff]  ;;  %v345_v24 = vld [vmem:[%s5958_s1 + $0x80] sm:$0xff]  ;;  %p4998_p11 = scmp.ne.s32.totalorder %s4215_s24, %s4997_s14  ;;  %s5003_s13 = scalar_lea.vmem %s5002_s21, 256 }
  0x1b   : > { %4547 = vmatpush3.msra.mxu0 %v329_v7  ;;  %4548 = vmatprep.mubr.msk.f32.mxu0 %vm5060_vm1, %v5059_v2  ;;  %v349_v25 = vld [vmem:[%s5958_s1 + $0xa0] sm:$0xff]  ;;  %v356_v26 = vld [vmem:[%s5958_s1 + $0xd8] sm:$0xff]  ;;  %v355_v28 = vld [vmem:[%s5958_s1 + $0xd0] sm:$0xff]  ;;  %p5004_p0 = scmp.lt.s32.totalorder %s4215_s24, %s5002_s21  ;;  %p5005_p1 = scmp.lt.s32.totalorder %s5003_s13, %s4997_s14 }
  0x1c   : > { %4558 = vmatpush3.msra.mxu1 %v333_v8  ;;  %4549 = vmatmul.mubr.msk.f32.vlgmr.msra.gmra.mxu0 %vm417_vm0, %v5195_v9  ;;  %v360_v27 = vld [vmem:[%s5958_s1 + $0xf8] sm:$0xff]  ;;  %v359_v29 = vld [vmem:[%s5958_s1 + $0xf0] sm:$0xff]  ;;  %v354_v30 = vld [vmem:[%s5958_s1 + $0xc8] sm:$0xff]  ;;  %p4999_p12 = pnand %p4998_p11, %p5150_p5 }
  0x1d   : > { %4559 = vmatprep.mubr.msk.f32.mxu1 %vm5060_vm1, %v5059_v2  ;;  %4562 = vmatprep.subr.mxu0 %v5059_v2  ;;  %v358_v31 = vld [vmem:[%s5958_s1 + $0xe8] sm:$0xff]  ;;  %v353_v32 = vld [vmem:[%s5958_s1 + $0xc0] sm:$0xff]  ;;  %v984_v34 = vld [vmem:[%s5960_s3 + $0x18] sm:$0xff]  ;;  %p5006_p2 = por %p5005_p1, %p5004_p0 }
  0x1e   : > { %4573 = vmatprep.subr.mxu1 %v5059_v2  ;;  %4560 = vmatmul.mubr.msk.f32.vlgmr.msra.gmra.mxu1 %vm417_vm0, %v5195_v9  ;;  %v357_v33 = vld [vmem:[%s5958_s1 + $0xe0] sm:$0xff]  ;;  %v988_v35 = vld [vmem:[%s5960_s3 + $0x38] sm:$0xff]  ;;  %v983_v36 = vld [vmem:[%s5960_s3 + $0x10] sm:$0xff]  ;;  %p5000_p13 = pneg %p4999_p12 }
  0x1f   : > { %4563 = vmatpush3.msra.mxu0 %v340_v10  ;;  %4574 = vmatpush3.msra.mxu1 %v344_v11  ;;  %v987_v37 = vld [vmem:[%s5960_s3 + $0x30] sm:$0xff]  ;;  %v982_v38 = vld [vmem:[%s5960_s3 + $0x8] sm:$0xff]  ;;  %v981_v40 = vld [vmem:[%s5960_s3] sm:$0xff] }
  0x20   : > { %4564 = vmatprep.subr.mxu0 %v5059_v2  ;;  %4575 = vmatprep.subr.mxu1 %v5059_v2  ;;  %v986_v39 = vld [vmem:[%s5960_s3 + $0x28] sm:$0xff]  ;;  %v985_v41 = vld [vmem:[%s5960_s3 + $0x20] sm:$0xff]  ;;  %v992_v42 = vld [vmem:[%s5960_s3 + $0x58] sm:$0xff]  ;;  %p5007_p3 = pnand %p5006_p2, %p5000_p13 }
  0x21   : > { %4565 = vmatpush3.msra.mxu0 %v339_v12  ;;  %4576 = vmatpush3.msra.mxu1 %v343_v13  ;;  %v996_v43 = vld [vmem:[%s5960_s3 + $0x78] sm:$0xff]  ;;  %v991_v44 = vld [vmem:[%s5960_s3 + $0x50] sm:$0xff]  ;;  %v990_v46 = vld [vmem:[%s5960_s3 + $0x48] sm:$0xff] }
  0x22   : > { %4566 = vmatprep.subr.mxu0 %v5059_v2  ;;  %4577 = vmatprep.subr.mxu1 %v5059_v2  ;;  %v995_v45 = vld [vmem:[%s5960_s3 + $0x70] sm:$0xff]  ;;  %v994_v47 = vld [vmem:[%s5960_s3 + $0x68] sm:$0xff]  ;;  %v989_v48 = vld [vmem:[%s5960_s3 + $0x40] sm:$0xff] }
  0x23   : > { %4567 = vmatpush3.msra.mxu0 %v338_v14  ;;  %4578 = vmatpush3.msra.mxu1 %v342_v15  ;;  %v993_v49 = vld [vmem:[%s5960_s3 + $0x60] sm:$0xff]  ;;  %v1000_v50 = vld [vmem:[%s5960_s3 + $0x98] sm:$0xff]  ;;  %v999_v52 = vld [vmem:[%s5960_s3 + $0x90] sm:$0xff] }
  0x24   : > { %4568 = vmatprep.subr.mxu0 %v5059_v2  ;;  %4579 = vmatprep.subr.mxu1 %v5059_v2  ;;  %v1004_v51 = vld [vmem:[%s5960_s3 + $0xb8] sm:$0xff]  ;;  %v1003_v53 = vld [vmem:[%s5960_s3 + $0xb0] sm:$0xff]  ;;  %v998_v54 = vld [vmem:[%s5960_s3 + $0x88] sm:$0xff] }
  0x25   : > { %4569 = vmatpush3.msra.mxu0 %v337_v16  ;;  %4570 = vmatprep.mubr.msk.f32.mxu0 %vm5060_vm1, %v5059_v2  ;;  %v1002_v55 = vld [vmem:[%s5960_s3 + $0xa8] sm:$0xff]  ;;  %v997_v56 = vld [vmem:[%s5960_s3 + $0x80] sm:$0xff]  ;;  %v1008_v58 = vld [vmem:[%s5960_s3 + $0xd8] sm:$0xff] }
  0x26   : > { %4580 = vmatpush3.msra.mxu1 %v341_v17  ;;  %4571 = vmatmul.mubr.msk.f32.vlgmr.msra.gmra.mxu0 %vm417_vm0, %v5195_v9  ;;  %v1001_v57 = vld [vmem:[%s5960_s3 + $0xa0] sm:$0xff]  ;;  %v1012_v59 = vld [vmem:[%s5960_s3 + $0xf8] sm:$0xff]  ;;  %v1007_v60 = vld [vmem:[%s5960_s3 + $0xd0] sm:$0xff] }
  0x27   : > { %4581 = vmatprep.mubr.msk.f32.mxu1 %vm5060_vm1, %v5059_v2  ;;  %4584 = vmatprep.subr.mxu0 %v5059_v2  ;;  %v1011_v61 = vld [vmem:[%s5960_s3 + $0xf0] sm:$0xff]  ;;  %v1006_v62 = vld [vmem:[%s5960_s3 + $0xc8] sm:$0xff]  ;;  %v1005_v0 = vld [vmem:[%s5960_s3 + $0xc0] sm:$0xff] }
  0x28   : > { %4595 = vmatprep.subr.mxu1 %v5059_v2  ;;  %4582 = vmatmul.mubr.msk.f32.vlgmr.msra.gmra.mxu1 %vm417_vm0, %v5195_v9  ;;  %v1010_v63 = vld [vmem:[%s5960_s3 + $0xe8] sm:$0xff]  ;;  %v1009_v1 = vld [vmem:[%s5960_s3 + $0xe0] sm:$0xff]  ;;  %v1632_v3 = vld [vmem:[%s5962_s5 + $0x18] sm:$0xff] }
  0x29   : > { %4585 = vmatpush3.msra.mxu0 %v348_v18  ;;  %4596 = vmatpush3.msra.mxu1 %v352_v19  ;;  %v1636_v4 = vld [vmem:[%s5962_s5 + $0x38] sm:$0xff]  ;;  %v1631_v5 = vld [vmem:[%s5962_s5 + $0x10] sm:$0xff]  ;;  %v1630_v7 = vld [vmem:[%s5962_s5 + $0x8] sm:$0xff] }
  0x2a   : > { %4586 = vmatprep.subr.mxu0 %v5059_v2  ;;  %4597 = vmatprep.subr.mxu1 %v5059_v2  ;;  %v1635_v6 = vld [vmem:[%s5962_s5 + $0x30] sm:$0xff]  ;;  %v1634_v8 = vld [vmem:[%s5962_s5 + $0x28] sm:$0xff]  ;;  %v1629_v10 = vld [vmem:[%s5962_s5] sm:$0xff] }
  0x2b   : > { %4587 = vmatpush3.msra.mxu0 %v347_v20  ;;  %4598 = vmatpush3.msra.mxu1 %v351_v21  ;;  %v1633_v11 = vld [vmem:[%s5962_s5 + $0x20] sm:$0xff]  ;;  %v1640_v12 = vld [vmem:[%s5962_s5 + $0x58] sm:$0xff]  ;;  %v1639_v14 = vld [vmem:[%s5962_s5 + $0x50] sm:$0xff] }
  0x2c   : > { %4588 = vmatprep.subr.mxu0 %v5059_v2  ;;  %4599 = vmatprep.subr.mxu1 %v5059_v2  ;;  %v1644_v13 = vld [vmem:[%s5962_s5 + $0x78] sm:$0xff]  ;;  %v1643_v15 = vld [vmem:[%s5962_s5 + $0x70] sm:$0xff]  ;;  %v1638_v16 = vld [vmem:[%s5962_s5 + $0x48] sm:$0xff] }
  0x2d   : > { %4589 = vmatpush3.msra.mxu0 %v346_v22  ;;  %4600 = vmatpush3.msra.mxu1 %v350_v23  ;;  %v1642_v17 = vld [vmem:[%s5962_s5 + $0x68] sm:$0xff]  ;;  %v1637_v18 = vld [vmem:[%s5962_s5 + $0x40] sm:$0xff]  ;;  %v1648_v20 = vld [vmem:[%s5962_s5 + $0x98] sm:$0xff] }
  0x2e   : > { %4590 = vmatprep.subr.mxu0 %v5059_v2  ;;  %4601 = vmatprep.subr.mxu1 %v5059_v2  ;;  %v1641_v19 = vld [vmem:[%s5962_s5 + $0x60] sm:$0xff]  ;;  %v1652_v21 = vld [vmem:[%s5962_s5 + $0xb8] sm:$0xff]  ;;  %v1647_v22 = vld [vmem:[%s5962_s5 + $0x90] sm:$0xff] }
  0x2f   : > { %4591 = vmatpush3.msra.mxu0 %v345_v24  ;;  %4592 = vmatprep.mubr.msk.f32.mxu0 %vm5060_vm1, %v5059_v2  ;;  %v1651_v23 = vld [vmem:[%s5962_s5 + $0xb0] sm:$0xff]  ;;  %v1646_v24 = vld [vmem:[%s5962_s5 + $0x88] sm:$0xff] }
  0x30   : > { %4602 = vmatpush3.msra.mxu1 %v349_v25  ;;  %4593 = vmatmul.mubr.msk.f32.vlgmr.msra.gmra.mxu0 %vm417_vm0, %v5195_v9  ;;  %v1650_v25 = vld [vmem:[%s5962_s5 + $0xa8] sm:$0xff] }
  0x31   : > { %4603 = vmatprep.mubr.msk.f32.mxu1 %vm5060_vm1, %v5059_v2  ;;  %4606 = vmatprep.subr.mxu0 %v5059_v2 }
  0x32   : > { %4617 = vmatprep.subr.mxu1 %v5059_v2  ;;  %4604 = vmatmul.mubr.msk.f32.vlgmr.msra.gmra.mxu1 %vm417_vm0, %v5195_v9 }
  0x33   : > { %4607 = vmatpush3.msra.mxu0 %v356_v26  ;;  %4618 = vmatpush3.msra.mxu1 %v360_v27  ;;  %v1645_v26 = vld [vmem:[%s5962_s5 + $0x80] sm:$0xff] }
  0x34   : > { %4608 = vmatprep.subr.mxu0 %v5059_v2  ;;  %4619 = vmatprep.subr.mxu1 %v5059_v2  ;;  %v1649_v27 = vld [vmem:[%s5962_s5 + $0xa0] sm:$0xff] }
  0x35   : > { %4609 = vmatpush3.msra.mxu0 %v355_v28  ;;  %4620 = vmatpush3.msra.mxu1 %v359_v29  ;;  %v1656_v28 = vld [vmem:[%s5962_s5 + $0xd8] sm:$0xff] }
  0x36   : > { %4610 = vmatprep.subr.mxu0 %v5059_v2  ;;  %4621 = vmatprep.subr.mxu1 %v5059_v2  ;;  %v1660_v29 = vld [vmem:[%s5962_s5 + $0xf8] sm:$0xff] }
  0x37   : > { %4611 = vmatpush3.msra.mxu0 %v354_v30  ;;  %4622 = vmatpush3.msra.mxu1 %v358_v31  ;;  %v1655_v30 = vld [vmem:[%s5962_s5 + $0xd0] sm:$0xff] }
  0x38   : > { %4612 = vmatprep.subr.mxu0 %v5059_v2  ;;  %4623 = vmatprep.subr.mxu1 %v5059_v2  ;;  %v1659_v31 = vld [vmem:[%s5962_s5 + $0xf0] sm:$0xff] }
  0x39   : > { %4613 = vmatpush3.msra.mxu0 %v353_v32  ;;  %4614 = vmatprep.mubr.msk.f32.mxu0 %vm5060_vm1, %v5059_v2  ;;  %v1654_v32 = vld [vmem:[%s5962_s5 + $0xc8] sm:$0xff] }
  0x3a   : > { %4624 = vmatpush3.msra.mxu1 %v357_v33  ;;  %4615 = vmatmul.mubr.msk.f32.vlgmr.msra.gmra.mxu0 %vm417_vm0, %v5195_v9  ;;  %v1658_v33 = vld [vmem:[%s5962_s5 + $0xe8] sm:$0xff] }
  0x3b   : > { %4625 = vmatprep.mubr.msk.f32.mxu1 %vm5060_vm1, %v5059_v2  ;;  %4628 = vmatprep.subr.mxu0 %v5059_v2 }
  0x3c   : > { %4639 = vmatprep.subr.mxu1 %v5059_v2  ;;  %4626 = vmatmul.mubr.msk.f32.vlgmr.msra.gmra.mxu1 %vm417_vm0, %v5195_v9 }
  0x3d   : > { %4629 = vmatpush3.msra.mxu0 %v984_v34  ;;  %4640 = vmatpush3.msra.mxu1 %v988_v35  ;;  %v1653_v34 = vld [vmem:[%s5962_s5 + $0xc0] sm:$0xff] }
  0x3e   : > { %4630 = vmatprep.subr.mxu0 %v5059_v2  ;;  %4641 = vmatprep.subr.mxu1 %v5059_v2  ;;  %v1657_v35 = vld [vmem:[%s5962_s5 + $0xe0] sm:$0xff] }
  0x3f   : > { %4631 = vmatpush3.msra.mxu0 %v983_v36  ;;  %4642 = vmatpush3.msra.mxu1 %v987_v37 }
  0x40   : > { %4632 = vmatprep.subr.mxu0 %v5059_v2  ;;  %4643 = vmatprep.subr.mxu1 %v5059_v2 }
  0x41   : > { %4633 = vmatpush3.msra.mxu0 %v982_v38  ;;  %4644 = vmatpush3.msra.mxu1 %v986_v39 }
  0x42   : > { %4634 = vmatprep.subr.mxu0 %v5059_v2  ;;  %4645 = vmatprep.subr.mxu1 %v5059_v2 }
  0x43   : > { %4635 = vmatpush3.msra.mxu0 %v981_v40  ;;  %4636 = vmatprep.mubr.msk.f32.mxu0 %vm5060_vm1, %v5059_v2 }
  0x44   : > { %4646 = vmatpush3.msra.mxu1 %v985_v41  ;;  %4647 = vmatprep.mubr.msk.f32.mxu1 %vm5060_vm1, %v5059_v2 }
  0x45   : > { %4637 = vmatmul.mubr.msk.f32.vlgmr.msra.gmra.mxu0 %vm417_vm0, %v5195_v9  ;;  %4648 = vmatmul.mubr.msk.f32.vlgmr.msra.gmra.mxu1 %vm417_vm0, %v5195_v9 }
  0x46   : > { %4650 = vmatprep.subr.mxu0 %v5059_v2  ;;  %4661 = vmatprep.subr.mxu1 %v5059_v2 }
  0x47   : > { %4651 = vmatpush3.msra.mxu0 %v992_v42  ;;  %4662 = vmatpush3.msra.mxu1 %v996_v43 }
  0x48   : > { %4652 = vmatprep.subr.mxu0 %v5059_v2  ;;  %4663 = vmatprep.subr.mxu1 %v5059_v2 }
  0x49   : > { %4653 = vmatpush3.msra.mxu0 %v991_v44  ;;  %4664 = vmatpush3.msra.mxu1 %v995_v45 }
  0x4a   : > { %4654 = vmatprep.subr.mxu0 %v5059_v2  ;;  %4665 = vmatprep.subr.mxu1 %v5059_v2 }
  0x4b   : > { %4655 = vmatpush3.msra.mxu0 %v990_v46  ;;  %4666 = vmatpush3.msra.mxu1 %v994_v47 }
  0x4c   : > { %4656 = vmatprep.subr.mxu0 %v5059_v2  ;;  %4667 = vmatprep.subr.mxu1 %v5059_v2 }
  0x4d   : > { %4657 = vmatpush3.msra.mxu0 %v989_v48  ;;  %4658 = vmatprep.mubr.msk.f32.mxu0 %vm5060_vm1, %v5059_v2 }
  0x4e   : > { %4668 = vmatpush3.msra.mxu1 %v993_v49  ;;  %4669 = vmatprep.mubr.msk.f32.mxu1 %vm5060_vm1, %v5059_v2 }
  0x4f   : > { %4659 = vmatmul.mubr.msk.f32.vlgmr.msra.gmra.mxu0 %vm417_vm0, %v5195_v9  ;;  %4670 = vmatmul.mubr.msk.f32.vlgmr.msra.gmra.mxu1 %vm417_vm0, %v5195_v9 }
  0x50   : > { %4672 = vmatprep.subr.mxu0 %v5059_v2  ;;  %4683 = vmatprep.subr.mxu1 %v5059_v2 }
  0x51   : > { %4673 = vmatpush3.msra.mxu0 %v1000_v50  ;;  %4684 = vmatpush3.msra.mxu1 %v1004_v51  ;;  %v4295_v51 = vld [vmem:[%s5961_s4] ss:$0 sm:$0xff] }
  0x52   : > { %4674 = vmatprep.subr.mxu0 %v5059_v2  ;;  %4685 = vmatprep.subr.mxu1 %v5059_v2 }
  0x53   : > { %4675 = vmatpush3.msra.mxu0 %v999_v52  ;;  %4686 = vmatpush3.msra.mxu1 %v1003_v53  ;;  %v4296_v52 = vld [vmem:[%s5961_s4 + $0x1] ss:$0 sm:$0xff] }
  0x54   : > { %4676 = vmatprep.subr.mxu0 %v5059_v2  ;;  %4687 = vmatprep.subr.mxu1 %v5059_v2 }
  0x55   : > { %4677 = vmatpush3.msra.mxu0 %v998_v54  ;;  %4688 = vmatpush3.msra.mxu1 %v1002_v55  ;;  %v4279_v55 = vld [vmem:[%s5959_s2] ss:$0 sm:$0xff] }
  0x56   : > { %4678 = vmatprep.subr.mxu0 %v5059_v2  ;;  %4689 = vmatprep.subr.mxu1 %v5059_v2 }
  0x57   : > { %4679 = vmatpush3.msra.mxu0 %v997_v56  ;;  %4680 = vmatprep.mubr.msk.f32.mxu0 %vm5060_vm1, %v5059_v2  ;;  %v4280_v56 = vld [vmem:[%s5959_s2 + $0x1] ss:$0 sm:$0xff] }
  0x58   : > { %4690 = vmatpush3.msra.mxu1 %v1001_v57  ;;  %4691 = vmatprep.mubr.msk.f32.mxu1 %vm5060_vm1, %v5059_v2 }
  0x59   : > { %4681 = vmatmul.mubr.msk.f32.vlgmr.msra.gmra.mxu0 %vm417_vm0, %v5195_v9  ;;  %4692 = vmatmul.mubr.msk.f32.vlgmr.msra.gmra.mxu1 %vm417_vm0, %v5195_v9 }
  0x5a   : > { %4694 = vmatprep.subr.mxu0 %v5059_v2  ;;  %4705 = vmatprep.subr.mxu1 %v5059_v2 }
  0x5b   : > { %4695 = vmatpush3.msra.mxu0 %v1008_v58  ;;  %4706 = vmatpush3.msra.mxu1 %v1012_v59 }
  0x5c   : > { %4696 = vmatprep.subr.mxu0 %v5059_v2  ;;  %4707 = vmatprep.subr.mxu1 %v5059_v2 }
  0x5d   : > { %4697 = vmatpush3.msra.mxu0 %v1007_v60  ;;  %4708 = vmatpush3.msra.mxu1 %v1011_v61 }
  0x5e   : > { %4698 = vmatprep.subr.mxu0 %v5059_v2  ;;  %4709 = vmatprep.subr.mxu1 %v5059_v2 }
  0x5f   : > { %4699 = vmatpush3.msra.mxu0 %v1006_v62  ;;  %4710 = vmatpush3.msra.mxu1 %v1010_v63  ;;  %v4297_v63 = vld [vmem:[%s5961_s4 + $0x2] ss:$0 sm:$0xff] }
  0x60   : > { %4700 = vmatprep.subr.mxu0 %v5059_v2  ;;  %4711 = vmatprep.subr.mxu1 %v5059_v2 }
  0x61   : > { %4701 = vmatpush3.msra.mxu0 %v1005_v0  ;;  %4702 = vmatprep.mubr.msk.f32.mxu0 %vm5060_vm1, %v5059_v2  ;;  %v4298_v0 = vld [vmem:[%s5961_s4 + $0x3] ss:$0 sm:$0xff] }
  0x62   : > { %4712 = vmatpush3.msra.mxu1 %v1009_v1  ;;  %4713 = vmatprep.mubr.msk.f32.mxu1 %vm5060_vm1, %v5059_v2 }
  0x63   : > { %4703 = vmatmul.mubr.msk.f32.vlgmr.msra.gmra.mxu0 %vm417_vm0, %v5195_v9  ;;  %4714 = vmatmul.mubr.msk.f32.vlgmr.msra.gmra.mxu1 %vm417_vm0, %v5195_v9 }
  0x64   : > { %4716 = vmatprep.subr.mxu0 %v5059_v2  ;;  %4727 = vmatprep.subr.mxu1 %v5059_v2 }
  0x65   : > { %4717 = vmatpush3.msra.mxu0 %v1632_v3  ;;  %4728 = vmatpush3.msra.mxu1 %v1636_v4  ;;  %v4281_v4 = vld [vmem:[%s5959_s2 + $0x2] ss:$0 sm:$0xff] }
  0x66   : > { %4718 = vmatprep.subr.mxu0 %v5059_v2  ;;  %4729 = vmatprep.subr.mxu1 %v5059_v2 }
  0x67   : > { %4719 = vmatpush3.msra.mxu0 %v1631_v5  ;;  %4730 = vmatpush3.msra.mxu1 %v1635_v6  ;;  %v4282_v5 = vld [vmem:[%s5959_s2 + $0x3] ss:$0 sm:$0xff] }
  0x68   : > { %4720 = vmatprep.subr.mxu0 %v5059_v2  ;;  %4731 = vmatprep.subr.mxu1 %v5059_v2 }
  0x69   : > { %4721 = vmatpush3.msra.mxu0 %v1630_v7  ;;  %4732 = vmatpush3.msra.mxu1 %v1634_v8 }
  0x6a   : > { %4722 = vmatprep.subr.mxu0 %v5059_v2  ;;  %4733 = vmatprep.subr.mxu1 %v5059_v2 }
  0x6b   : > { %4723 = vmatpush3.msra.mxu0 %v1629_v10  ;;  %4734 = vmatpush3.msra.mxu1 %v1633_v11 }
  0x6c   : > { %4724 = vmatprep.mubr.msk.f32.mxu0 %vm5060_vm1, %v5059_v2  ;;  %4735 = vmatprep.mubr.msk.f32.mxu1 %vm5060_vm1, %v5059_v2 }
  0x6d   : > { %4738 = vmatprep.subr.mxu0 %v5059_v2  ;;  %4749 = vmatprep.subr.mxu1 %v5059_v2 }
  0x6e   : > { %4725 = vmatmul.mubr.msk.f32.vlgmr.msra.gmra.mxu0 %vm417_vm0, %v5195_v9  ;;  %4736 = vmatmul.mubr.msk.f32.vlgmr.msra.gmra.mxu1 %vm417_vm0, %v5195_v9 }
  0x6f   : > { %4739 = vmatpush3.msra.mxu0 %v1640_v12  ;;  %4750 = vmatpush3.msra.mxu1 %v1644_v13  ;;  %v4299_v13 = vld [vmem:[%s5961_s4 + $0x4] ss:$0 sm:$0xff] }
  0x70   : > { %4740 = vmatprep.subr.mxu0 %v5059_v2  ;;  %4751 = vmatprep.subr.mxu1 %v5059_v2 }
  0x71   : > { %4741 = vmatpush3.msra.mxu0 %v1639_v14  ;;  %4752 = vmatpush3.msra.mxu1 %v1643_v15  ;;  %v4300_v14 = vld [vmem:[%s5961_s4 + $0x5] ss:$0 sm:$0xff] }
  0x72   : > { %4742 = vmatprep.subr.mxu0 %v5059_v2  ;;  %4753 = vmatprep.subr.mxu1 %v5059_v2 }
  0x73   : > { %4743 = vmatpush3.msra.mxu0 %v1638_v16  ;;  %4754 = vmatpush3.msra.mxu1 %v1642_v17  ;;  %v4283_v17 = vld [vmem:[%s5959_s2 + $0x4] ss:$0 sm:$0xff] }
  0x74   : > { %4744 = vmatprep.subr.mxu0 %v5059_v2  ;;  %4755 = vmatprep.subr.mxu1 %v5059_v2 }
  0x75   : > { %4745 = vmatpush3.msra.mxu0 %v1637_v18  ;;  %4756 = vmatpush3.msra.mxu1 %v1641_v19  ;;  %v4284_v18 = vld [vmem:[%s5959_s2 + $0x5] ss:$0 sm:$0xff] }
  0x76   : > { %4746 = vmatprep.mubr.msk.f32.mxu0 %vm5060_vm1, %v5059_v2  ;;  %4757 = vmatprep.mubr.msk.f32.mxu1 %vm5060_vm1, %v5059_v2 }
  0x77   : > { %4760 = vmatprep.subr.mxu0 %v5059_v2  ;;  %4771 = vmatprep.subr.mxu1 %v5059_v2 }
  0x78   : > { %4747 = vmatmul.mubr.msk.f32.vlgmr.msra.gmra.mxu0 %vm417_vm0, %v5195_v9  ;;  %4758 = vmatmul.mubr.msk.f32.vlgmr.msra.gmra.mxu1 %vm417_vm0, %v5195_v9 }
  0x79   : > { %4761 = vmatpush3.msra.mxu0 %v1648_v20  ;;  %4772 = vmatpush3.msra.mxu1 %v1652_v21 }
  0x7a   : > { %4762 = vmatprep.subr.mxu0 %v5059_v2  ;;  %4773 = vmatprep.subr.mxu1 %v5059_v2 }
  0x7b   : > { %4763 = vmatpush3.msra.mxu0 %v1647_v22  ;;  %4774 = vmatpush3.msra.mxu1 %v1651_v23 }
  0x7c   : > { %4764 = vmatprep.subr.mxu0 %v5059_v2  ;;  %4775 = vmatprep.subr.mxu1 %v5059_v2 }
  0x7d   : > { %4765 = vmatpush3.msra.mxu0 %v1646_v24  ;;  %4776 = vmatpush3.msra.mxu1 %v1650_v25  ;;  %v4301_v25 = vld [vmem:[%s5961_s4 + $0x6] ss:$0 sm:$0xff] }
  0x7e   : > { %4766 = vmatprep.subr.mxu0 %v5059_v2  ;;  %4777 = vmatprep.subr.mxu1 %v5059_v2 }
  0x7f   : > { %4767 = vmatpush3.msra.mxu0 %v1645_v26  ;;  %4778 = vmatpush3.msra.mxu1 %v1649_v27  ;;  %v4302_v26 = vld [vmem:[%s5961_s4 + $0x7] ss:$0 sm:$0xff] }
  0x80   : > { %4768 = vmatprep.mubr.msk.f32.mxu0 %vm5060_vm1, %v5059_v2  ;;  %4779 = vmatprep.mubr.msk.f32.mxu1 %vm5060_vm1, %v5059_v2 }
  0x81   : > { %4782 = vmatprep.subr.mxu0 %v5059_v2  ;;  %4793 = vmatprep.subr.mxu1 %v5059_v2 }
  0x82   : > { %4769 = vmatmul.mubr.msk.f32.vlgmr.msra.gmra.mxu0 %vm417_vm0, %v5195_v9  ;;  %4780 = vmatmul.mubr.msk.f32.vlgmr.msra.gmra.mxu1 %vm417_vm0, %v5195_v9 }
  0x83   : > { %4783 = vmatpush3.msra.mxu0 %v1656_v28  ;;  %4794 = vmatpush3.msra.mxu1 %v1660_v29  ;;  %v4285_v29 = vld [vmem:[%s5959_s2 + $0x6] ss:$0 sm:$0xff] }
  0x84   : > { %4784 = vmatprep.subr.mxu0 %v5059_v2  ;;  %4795 = vmatprep.subr.mxu1 %v5059_v2 }
  0x85   : > { %4785 = vmatpush3.msra.mxu0 %v1655_v30  ;;  %4796 = vmatpush3.msra.mxu1 %v1659_v31  ;;  %v4286_v30 = vld [vmem:[%s5959_s2 + $0x7] ss:$0 sm:$0xff] }
  0x86   : > { %4786 = vmatprep.subr.mxu0 %v5059_v2  ;;  %4797 = vmatprep.subr.mxu1 %v5059_v2 }
  0x87   : > { %4787 = vmatpush3.msra.mxu0 %v1654_v32  ;;  %4798 = vmatpush3.msra.mxu1 %v1658_v33 }
  0x88   : > { %4788 = vmatprep.subr.mxu0 %v5059_v2  ;;  %4799 = vmatprep.subr.mxu1 %v5059_v2 }
  0x89   : > { %4789 = vmatpush3.msra.mxu0 %v1653_v34  ;;  %4790 = vmatprep.mubr.msk.f32.mxu0 %vm5060_vm1, %v5059_v2 }
  0x8a   : > { %4800 = vmatpush3.msra.mxu1 %v1657_v35  ;;  %4801 = vmatprep.mubr.msk.f32.mxu1 %vm5060_vm1, %v5059_v2 }
  0x8b   : > { %4791 = vmatmul.mubr.msk.f32.vlgmr.msra.gmra.mxu0 %vm417_vm0, %v5195_v9  ;;  %4802 = vmatmul.mubr.msk.f32.vlgmr.msra.gmra.mxu1 %vm417_vm0, %v5195_v9 }
  0x8c   : > { %4804 = vmatprep.subr.mxu0 %v5059_v2  ;;  %4809 = vmatprep.subr.mxu1 %v5059_v2 }
  0x8d   : > { %4806 = vmatprep.mubr.msk.f32.mxu0 %vm5060_vm1, %v5059_v2  ;;  %4811 = vmatprep.mubr.msk.f32.mxu1 %vm5060_vm1, %v5059_v2 }
  0xdc   : > { %v487_v36 = vpop.f32.mrf.mxu0 }
  0xdd   : > { %v488_v61 = vadd.f32 %v4279_v55, %v487_v36 }
  0xde   : > { %v557_v37 = vpop.f32.mrf.mxu1  ;;  %v4550_v38 = vpop.f32.mrf.mxu0 }
  0xdf   : > { %v558_v62 = vadd.f32 %v4280_v56, %v557_v37  ;;  %v4311_v37 = vld [vmem:[%s5963_s6] ss:$0 sm:$0xff]  ;;  %v4312_v38 = vld [vmem:[%s5963_s6 + $0x1] ss:$0 sm:$0xff] }
  0xe0   : > { %v4561_v39 = vpop.f32.mrf.mxu1 }
  0xe6   : > { %v627_v40 = vpop.f32.mrf.mxu0 }
  0xe7   : > { %v628_v11 = vadd.f32 %v4281_v4, %v627_v40 }
  0xe8   : > { %v697_v41 = vpop.f32.mrf.mxu1  ;;  %v4572_v42 = vpop.f32.mrf.mxu0 }
  0xe9   : > { %v698_v12 = vadd.f32 %v4282_v5, %v697_v41 }
  0xea   : > { %v4583_v43 = vpop.f32.mrf.mxu1 }
  0xf0   : > { %v767_v44 = vpop.f32.mrf.mxu0 }
  0xf1   : > { %v768_v23 = vadd.f32 %v4283_v17, %v767_v44 }
  0xf2   : > { %v837_v9 = vpop.f32.mrf.mxu1  ;;  %v4594_v45 = vpop.f32.mrf.mxu0 }
  0xf3   : > { %v838_v24 = vadd.f32 %v4284_v18, %v837_v9 }
  0xf4   : > { %v4605_v46 = vpop.f32.mrf.mxu1 }
  0xfa   : > { %v5653_v47 = vpop.f32.mrf.mxu0 }
  0xfb   : > { %v908_v35 = vadd.f32 %v4285_v29, %v5653_v47 }
  0xfc   : > { %v5655_v48 = vpop.f32.mrf.mxu1  ;;  %v4616_v49 = vpop.f32.mrf.mxu0 }
  0xfd   : > { %v978_v36 = vadd.f32 %v4286_v30, %v5655_v48 }
  0xfe   : > { %v4627_v50 = vpop.f32.mrf.mxu1 }
 0x105   : > { %v1135_v53 = vpop.f32.mrf.mxu0  ;;  %v1205_v54 = vpop.f32.mrf.mxu1 }
 0x106   : > { %v1136_v57 = vadd.f32 %v4295_v51, %v1135_v53  ;;  %v1206_v58 = vadd.f32 %v4296_v52, %v1205_v54 }
 0x107   : > { %v4638_v59 = vpop.f32.mrf.mxu0  ;;  %v4649_v60 = vpop.f32.mrf.mxu1 }
 0x108   : > { %4805 = vmatpush3.xpose.msk.msra.mxu0 %vm2277_vm2, %v1136_v57  ;;  %4810 = vmatpush3.xpose.msk.msra.mxu1 %vm2277_vm2, %v1206_v58 }
 0x109   : > { %4814 = vmatprep.subr.mxu0 %v5059_v2  ;;  %4819 = vmatprep.subr.mxu1 %v5059_v2 }
 0x10b   : > { %4807 = vmatmul.mubr.msk.f32.vlgmr.msra.gmra.mxu0 %vm2277_vm2, %v488_v61  ;;  %4812 = vmatmul.mubr.msk.f32.vlgmr.msra.gmra.mxu1 %vm2277_vm2, %v558_v62 }
 0x10c   : > { %4816 = vmatprep.mubr.msk.f32.mxu0 %vm5060_vm1, %v5059_v2  ;;  %4821 = vmatprep.mubr.msk.f32.mxu1 %vm5060_vm1, %v5059_v2 }
 0x10f   : > { %v1275_v1 = vpop.f32.mrf.mxu0  ;;  %v1345_v3 = vpop.f32.mrf.mxu1 }
 0x110   : > { %v1276_v6 = vadd.f32 %v4297_v63, %v1275_v1  ;;  %v1346_v7 = vadd.f32 %v4298_v0, %v1345_v3 }
 0x111   : > { %v4660_v8 = vpop.f32.mrf.mxu0  ;;  %v4671_v10 = vpop.f32.mrf.mxu1 }
 0x112   : > { %4815 = vmatpush3.xpose.msk.msra.mxu0 %vm2277_vm2, %v1276_v6  ;;  %4820 = vmatpush3.xpose.msk.msra.mxu1 %vm2277_vm2, %v1346_v7 }
 0x113   : > { %4824 = vmatprep.subr.mxu0 %v5059_v2  ;;  %4829 = vmatprep.subr.mxu1 %v5059_v2 }
 0x115   : > { %4817 = vmatmul.mubr.msk.f32.vlgmr.msra.gmra.mxu0 %vm2277_vm2, %v628_v11  ;;  %4822 = vmatmul.mubr.msk.f32.vlgmr.msra.gmra.mxu1 %vm2277_vm2, %v698_v12 }
 0x116   : > { %4826 = vmatprep.mubr.msk.f32.mxu0 %vm5060_vm1, %v5059_v2  ;;  %4831 = vmatprep.mubr.msk.f32.mxu1 %vm5060_vm1, %v5059_v2 }
 0x119   : > { %v1415_v15 = vpop.f32.mrf.mxu0  ;;  %v1485_v16 = vpop.f32.mrf.mxu1 }
 0x11a   : > { %v1416_v19 = vadd.f32 %v4299_v13, %v1415_v15  ;;  %v1486_v20 = vadd.f32 %v4300_v14, %v1485_v16 }
 0x11b   : > { %v4682_v21 = vpop.f32.mrf.mxu0  ;;  %v4693_v22 = vpop.f32.mrf.mxu1 }
 0x11c   : > { %4825 = vmatpush3.xpose.msk.msra.mxu0 %vm2277_vm2, %v1416_v19  ;;  %4830 = vmatpush3.xpose.msk.msra.mxu1 %vm2277_vm2, %v1486_v20 }
 0x11d   : > { %4834 = vmatprep.subr.mxu0 %v5059_v2  ;;  %4839 = vmatprep.subr.mxu1 %v5059_v2 }
 0x11f   : > { %4827 = vmatmul.mubr.msk.f32.vlgmr.msra.gmra.mxu0 %vm2277_vm2, %v768_v23  ;;  %4832 = vmatmul.mubr.msk.f32.vlgmr.msra.gmra.mxu1 %vm2277_vm2, %v838_v24 }
 0x120   : > { %4836 = vmatprep.mubr.msk.f32.mxu0 %vm5060_vm1, %v5059_v2  ;;  %4841 = vmatprep.mubr.msk.f32.mxu1 %vm5060_vm1, %v5059_v2 }
 0x123   : > { %v1555_v27 = vpop.f32.mrf.mxu0  ;;  %v1625_v28 = vpop.f32.mrf.mxu1 }
 0x124   : > { %v1556_v31 = vadd.f32 %v4301_v25, %v1555_v27  ;;  %v1626_v32 = vadd.f32 %v4302_v26, %v1625_v28 }
 0x125   : > { %v4704_v33 = vpop.f32.mrf.mxu0  ;;  %v4715_v34 = vpop.f32.mrf.mxu1 }
 0x126   : > { %4835 = vmatpush3.xpose.msk.msra.mxu0 %vm2277_vm2, %v1556_v31  ;;  %4840 = vmatpush3.xpose.msk.msra.mxu1 %vm2277_vm2, %v1626_v32 }
 0x127   : > { %4844 = vmatprep.subr.mxu0 %v5059_v2  ;;  %4849 = vmatprep.subr.mxu1 %v5059_v2 }
 0x129   : > { %4837 = vmatmul.mubr.msk.f32.vlgmr.msra.gmra.mxu0 %vm2277_vm2, %v908_v35  ;;  %4842 = vmatmul.mubr.msk.f32.vlgmr.msra.gmra.mxu1 %vm2277_vm2, %v978_v36 }
 0x12a   : > { %4846 = vmatprep.mubr.msk.f32.mxu0 %vm5060_vm1, %v5059_v2  ;;  %4851 = vmatprep.mubr.msk.f32.mxu1 %vm5060_vm1, %v5059_v2 }
 0x12e   : > { %v1783_v39 = vpop.f32.mrf.mxu0  ;;  %v1853_v40 = vpop.f32.mrf.mxu1 }
 0x12f   : > { %v1784_v41 = vadd.f32 %v4311_v37, %v1783_v39  ;;  %v1854_v42 = vadd.f32 %v4312_v38, %v1853_v40 }
 0x130   : > { %v4726_v43 = vpop.f32.mrf.mxu0  ;;  %v4737_v44 = vpop.f32.mrf.mxu1 }
 0x131   : > { %4845 = vmatpush3.msra.mxu0 %v1784_v41  ;;  %4850 = vmatpush3.msra.mxu1 %v1854_v42 }
 0x132   : > { %4854 = vmatprep.subr.mxu0 %v5059_v2  ;;  %4859 = vmatprep.subr.mxu1 %v5059_v2 }
 0x138   : > { %v5755_v9 = vpop.f32.mrf.mxu0  ;;  %v5757_v45 = vpop.f32.mrf.mxu1 }
 0x13a   : > { %v4748_v46 = vpop.f32.mrf.mxu0  ;;  %v4759_v47 = vpop.f32.mrf.mxu1 }
 0x142   : > { %v5759_v48 = vpop.f32.mrf.mxu0  ;;  %v5761_v49 = vpop.f32.mrf.mxu1 }
 0x144   : > { %v4770_v50 = vpop.f32.mrf.mxu0  ;;  %v4781_v51 = vpop.f32.mrf.mxu1 }
 0x14b   : > { %v5763_v52 = vpop.f32.mrf.mxu0  ;;  %v5765_v53 = vpop.f32.mrf.mxu1 }
 0x14d   : > { %v4792_v54 = vpop.f32.mrf.mxu0  ;;  %v4803_v55 = vpop.f32.mrf.mxu1 }
 0x1cb   : > { %v2350_v56 = vpop.f32.mrf.mxu0  ;;  %v2426_v57 = vpop.f32.mrf.mxu1 }
 0x1cc   : > { %v2887_v58 = vsel %vm2886_vm3, %v2350_v56, -inf  ;;  %v2890_v61 = vsel %vm2886_vm3, %v2426_v57, -inf }
 0x1cd   : > { %v4813_v59 = vpop.f32.mrf.mxu1  ;;  %2888 = vmax.xlane.f32.xlu0 %v2887_v58  ;;  %v4808_v60 = vpop.f32.mrf.mxu0 }
 0x1d1   : > { %2891 = vmax.xlane.f32.xlu0 %v2890_v61 }
 0x1d5   : > { %v2502_v62 = vpop.f32.mrf.mxu0  ;;  %v2578_v63 = vpop.f32.mrf.mxu1 }
 0x1d6   : > { %v2893_v0 = vsel %vm2886_vm3, %v2502_v62, -inf  ;;  %v2896_v4 = vsel %vm2886_vm3, %v2578_v63, -inf }
 0x1d7   : > { %v4823_v1 = vpop.f32.mrf.mxu1  ;;  %2894 = vmax.xlane.f32.xlu1 %v2893_v0  ;;  %v4818_v3 = vpop.f32.mrf.mxu0 }
 0x1d8   : > { %v4313_v3 = vld [vmem:[%s5963_s6 + $0x2] ss:$0 sm:$0xff] }
 0x1db   : > { %2897 = vmax.xlane.f32.xlu1 %v2896_v4 }
 0x1df   : > { %v2654_v5 = vpop.f32.mrf.mxu0  ;;  %v2730_v6 = vpop.f32.mrf.mxu1 }
 0x1e0   : > { %v2902_v7 = vsel %vm2886_vm3, %v2730_v6, -inf  ;;  %v2899_v8 = vsel %vm2886_vm3, %v2654_v5, -inf }
 0x1e1   : > { %v4833_v10 = vpop.f32.mrf.mxu1  ;;  %2903 = vmax.xlane.f32.xlu1 %v2902_v7  ;;  %2900 = vmax.xlane.f32.xlu0 %v2899_v8  ;;  %v4828_v11 = vpop.f32.mrf.mxu0  ;;  %v1924_v7 = vadd.f32 %v4313_v3, %v5755_v9  ;;  %v4314_v8 = vld [vmem:[%s5963_s6 + $0x3] ss:$0 sm:$0xff]  ;;  %v4315_v9 = vld [vmem:[%s5963_s6 + $0x4] ss:$0 sm:$0xff] }
 0x1e9   : > { %v2806_v12 = vpop.f32.mrf.mxu0  ;;  %v2882_v13 = vpop.f32.mrf.mxu1 }
 0x1ea   : > { %v2908_v14 = vsel %vm2886_vm3, %v2882_v13, -inf  ;;  %v2905_v15 = vsel %vm2886_vm3, %v2806_v12, -inf }
 0x1eb   : > { %v4843_v16 = vpop.f32.mrf.mxu1  ;;  %2909 = vmax.xlane.f32.xlu1 %v2908_v14  ;;  %2906 = vmax.xlane.f32.xlu0 %v2905_v15  ;;  %v4838_v17 = vpop.f32.mrf.mxu0 }
 0x1ec   : > { %v4316_v17 = vld [vmem:[%s5963_s6 + $0x5] ss:$0 sm:$0xff] }
 0x256   : > { %v2889_v18 = vpop.xlane.xlu0 %2888 }
 0x257   : > { %v2911_v19 = vsub.f32 %v2350_v56, %v2889_v18 }
 0x259   : > { %v2919_v20 = vmul.f32 1.442695, %v2911_v19 }
 0x25a   : > { %v2892_v21 = vpop.xlane.xlu0 %2891 }
 0x25b   : > { %4965 = vpow2.f32 %v2919_v20  ;;  %v2912_v22 = vsub.f32 %v2426_v57, %v2892_v21  ;;  %v2134_v20 = vadd.f32 %v4316_v17, %v5761_v49  ;;  %v4317_v49 = vld [vmem:[%s5963_s6 + $0x6] ss:$0 sm:$0xff] }
 0x25d   : > { %v2921_v23 = vmul.f32 1.442695, %v2912_v22 }
 0x25f   : > { %4967 = vpow2.f32 %v2921_v23 }
 0x260   : > { %v2895_v24 = vpop.xlane.xlu1 %2894 }
 0x261   : > { %v2913_v25 = vsub.f32 %v2502_v62, %v2895_v24 }
 0x263   : > { %v2923_v26 = vmul.f32 1.442695, %v2913_v25 }
 0x264   : > { %v2898_v27 = vpop.xlane.xlu1 %2897 }
 0x265   : > { %4969 = vpow2.f32 %v2923_v26  ;;  %v2914_v28 = vsub.f32 %v2578_v63, %v2898_v27 }
 0x267   : > { %v2925_v29 = vmul.f32 1.442695, %v2914_v28  ;;  %v2204_v28 = vadd.f32 %v4317_v49, %v5763_v52  ;;  %v4367_v49 = vld [vmem:[%s5965_s8] ss:$0 sm:$0xff] }
 0x268   : > { %v4966_v30 = vpop.eup %4965 }
 0x269   : > { %4971 = vpow2.f32 %v2925_v29  ;;  %v2935_v31 = vsel %vm2886_vm3, %v4966_v30, 0.0 }
 0x26a   : > { %v2904_v32 = vpop.xlane.xlu1 %2903  ;;  %v2901_v33 = vpop.xlane.xlu0 %2900  ;;  %2936 = vadd.xlane.f32.xlu0 %v2935_v31  ;;  %v3559_v31 = vld [vmem:[%s5964_s7] sm:$0xf] }
 0x26b   : > { %v2916_v34 = vsub.f32 %v2730_v6, %v2904_v32  ;;  %v2915_v35 = vsub.f32 %v2654_v5, %v2901_v33  ;;  %v3560_v32 = vld [vmem:[%s5964_s7 + $0x4] sm:$0xf]  ;;  %v3561_v33 = vld [vmem:[%s5964_s7 + $0x8] sm:$0xf] }
 0x26c   : > { %v4968_v36 = vpop.eup %4967 }
 0x26d   : > { %v2929_v37 = vmul.f32 1.442695, %v2916_v34  ;;  %v2927_v38 = vmul.f32 1.442695, %v2915_v35  ;;  %v2938_v39 = vsel %vm2886_vm3, %v4968_v36, 0.0 }
 0x26e   : > { %2939 = vadd.xlane.f32.xlu1 %v2938_v39  ;;  %v3563_v39 = vld [vmem:[%s5964_s7 + $0x10] sm:$0xf] }
 0x26f   : > { %4973 = vpow2.f32 %v2929_v37 }
 0x270   : > { %4975 = vpow2.f32 %v2927_v38 }
 0x272   : > { %v4970_v40 = vpop.eup %4969 }
 0x273   : > { %v2941_v41 = vsel %vm2886_vm3, %v4970_v40, 0.0 }
 0x274   : > { %v2910_v42 = vpop.xlane.xlu1 %2909  ;;  %v2907_v43 = vpop.xlane.xlu0 %2906  ;;  %2942 = vadd.xlane.f32.xlu0 %v2941_v41 }
 0x275   : > { %v2918_v44 = vsub.f32 %v2882_v13, %v2910_v42  ;;  %v2917_v46 = vsub.f32 %v2806_v12, %v2907_v43  ;;  %v1994_v12 = vadd.f32 %v4314_v8, %v5757_v45  ;;  %v2064_v45 = vadd.f32 %v4315_v9, %v5759_v48  ;;  %v4318_v48 = vld [vmem:[%s5963_s6 + $0x7] ss:$0 sm:$0xff]  ;;  %v3564_v42 = vld [vmem:[%s5964_s7 + $0x14] sm:$0xf] }
 0x276   : > { %v4972_v47 = vpop.eup %4971  ;;  %v2274_v26 = vadd.f32 %v4318_v48, %v5765_v53 }
 0x277   : > { %v2933_v50 = vmul.f32 1.442695, %v2918_v44  ;;  %v2931_v51 = vmul.f32 1.442695, %v2917_v46  ;;  %v2944_v54 = vsel %vm2886_vm3, %v4972_v47, 0.0 }
 0x278   : > { %2945 = vadd.xlane.f32.xlu1 %v2944_v54  ;;  %v3566_v46 = vld [vmem:[%s5964_s7 + $0x1c] sm:$0xf] }
 0x279   : > { %4977 = vpow2.f32 %v2933_v50  ;;  %v3565_v50 = vld [vmem:[%s5964_s7 + $0x18] sm:$0xf] }
 0x27a   : > { %4979 = vpow2.f32 %v2931_v51 }
 0x27c   : > { %v5779_v55 = vpop.eup %4973 }
 0x27d   : > { %v5781_v56 = vpop.eup %4975  ;;  %v2950_v57 = vsel %vm2886_vm3, %v5779_v55, 0.0 }
 0x27e   : > { %2951 = vadd.xlane.f32.xlu1 %v2950_v57  ;;  %v2947_v58 = vsel %vm2886_vm3, %v5781_v56, 0.0 }
 0x27f   : > { %2948 = vadd.xlane.f32.xlu0 %v2947_v58 }
 0x286   : > { %v5787_v59 = vpop.eup %4977 }
 0x287   : > { %v5789_v60 = vpop.eup %4979  ;;  %v2956_v61 = vsel %vm2886_vm3, %v5787_v59, 0.0 }
 0x288   : > { %2957 = vadd.xlane.f32.xlu1 %v2956_v61  ;;  %v2953_v62 = vsel %vm2886_vm3, %v5789_v60, 0.0 }
 0x289   : > { %2954 = vadd.xlane.f32.xlu0 %v2953_v62 }
 0x2f3   : > { %v2937_v63 = vpop.xlane.xlu0 %2936 }
 0x2f4   : > { %4981 = vrcp.f32 %v2937_v63 }
 0x2f7   : > { %v2940_v0 = vpop.xlane.xlu1 %2939 }
 0x2f8   : > { %4983 = vrcp.f32 %v2940_v0 }
 0x2fd   : > { %v2943_v1 = vpop.xlane.xlu0 %2942 }
 0x2fe   : > { %4985 = vrcp.f32 %v2943_v1 }
 0x301   : > { %v4982_v4 = vpop.eup %4981  ;;  %v2946_v5 = vpop.xlane.xlu1 %2945 }
 0x302   : > { %4987 = vrcp.f32 %v2946_v5  ;;  %v2967_v6 = vmul.f32 %v4982_v4, %v4966_v30 }
 0x304   : > { %4847 = vmatmul.mubr.msk.f32.vlgmr.msra.gmra.mxu0 %vm2886_vm3, %v2967_v6 }
 0x305   : > { %v4984_v10 = vpop.eup %4983  ;;  %4855 = vmatpush3.msra.mxu0 %v1924_v7  ;;  %4856 = vmatprep.mubr.msk.f32.mxu0 %vm5060_vm1, %v5059_v2 }
 0x306   : > { %v2968_v11 = vmul.f32 %v4984_v10, %v4968_v36  ;;  %4864 = vmatprep.subr.mxu0 %v5059_v2  ;;  %v3562_v36 = vld [vmem:[%s5964_s7 + $0xc] sm:$0xf] }
 0x307   : > { %v2952_v13 = vpop.xlane.xlu1 %2951 }
 0x308   : > { %4989 = vrcp.f32 %v2952_v13  ;;  %v2949_v14 = vpop.xlane.xlu0 %2948  ;;  %4852 = vmatmul.mubr.msk.f32.vlgmr.msra.gmra.mxu1 %vm2886_vm3, %v2968_v11 }
 0x309   : > { %4991 = vrcp.f32 %v2949_v14  ;;  %4860 = vmatpush3.msra.mxu1 %v1994_v12  ;;  %4861 = vmatprep.mubr.msk.f32.mxu1 %vm5060_vm1, %v5059_v2 }
 0x30a   : > { %4869 = vmatprep.subr.mxu1 %v5059_v2 }
 0x30b   : > { %v4986_v15 = vpop.eup %4985 }
 0x30c   : > { %v2969_v16 = vmul.f32 %v4986_v15, %v4970_v40 }
 0x30e   : > { %4857 = vmatmul.mubr.msk.f32.vlgmr.msra.gmra.mxu0 %vm2886_vm3, %v2969_v16 }
 0x30f   : > { %v4988_v18 = vpop.eup %4987  ;;  %4865 = vmatpush3.msra.mxu0 %v2064_v45  ;;  %4866 = vmatprep.mubr.msk.f32.mxu0 %vm5060_vm1, %v5059_v2 }
 0x310   : > { %v2970_v19 = vmul.f32 %v4988_v18, %v4972_v47  ;;  %4874 = vmatprep.subr.mxu0 %v5059_v2 }
 0x311   : > { %v2958_v21 = vpop.xlane.xlu1 %2957 }
 0x312   : > { %4993 = vrcp.f32 %v2958_v21  ;;  %v2955_v22 = vpop.xlane.xlu0 %2954  ;;  %4862 = vmatmul.mubr.msk.f32.vlgmr.msra.gmra.mxu1 %vm2886_vm3, %v2970_v19 }
 0x313   : > { %4995 = vrcp.f32 %v2955_v22  ;;  %4870 = vmatpush3.msra.mxu1 %v2134_v20  ;;  %4871 = vmatprep.mubr.msk.f32.mxu1 %vm5060_vm1, %v5059_v2 }
 0x314   : > { %4879 = vmatprep.subr.mxu1 %v5059_v2 }
 0x315   : > { %v4990_v23 = vpop.eup %4989 }
 0x316   : > { %v4992_v24 = vpop.eup %4991  ;;  %v2972_v25 = vmul.f32 %v4990_v23, %v5779_v55 }
 0x317   : > { %v2971_v27 = vmul.f32 %v4992_v24, %v5781_v56 }
 0x318   : > { %4872 = vmatmul.mubr.msk.f32.vlgmr.msra.gmra.mxu1 %vm2886_vm3, %v2972_v25 }
 0x319   : > { %4867 = vmatmul.mubr.msk.f32.vlgmr.msra.gmra.mxu0 %vm2886_vm3, %v2971_v27  ;;  %4880 = vmatpush3.msra.mxu1 %v2274_v26 }
 0x31a   : > { %4875 = vmatpush3.msra.mxu0 %v2204_v28  ;;  %4876 = vmatprep.mubr.msk.f32.mxu0 %vm5060_vm1, %v5059_v2 }
 0x31b   : > { %4881 = vmatprep.mubr.msk.f32.mxu1 %vm5060_vm1, %v5059_v2  ;;  %4884 = vmatprep.subr.mxu0 %v5059_v2 }
 0x31c   : > { %4889 = vmatprep.subr.mxu1 %v5059_v2 }
 0x31f   : > { %v4994_v53 = vpop.eup %4993 }
 0x320   : > { %v4996_v29 = vpop.eup %4995  ;;  %v2974_v52 = vmul.f32 %v4994_v53, %v5787_v59 }
 0x321   : > { %v2973_v30 = vmul.f32 %v4996_v29, %v5789_v60 }
 0x322   : > { %4882 = vmatmul.mubr.msk.f32.vlgmr.msra.gmra.mxu1 %vm2886_vm3, %v2974_v52 }
 0x323   : > { %4877 = vmatmul.mubr.msk.f32.vlgmr.msra.gmra.mxu0 %vm2886_vm3, %v2973_v30  ;;  %4891 = vmatprep.mubr.msk.f32.mxu1 %vm5060_vm1, %v5059_v2 }
 0x324   : > { %4886 = vmatprep.mubr.msk.f32.mxu0 %vm5060_vm1, %v5059_v2  ;;  %4885 = vmatpush3.msk.msra.mxu0 %vm3570_vm4, %v3559_v31 }
 0x325   : > { %4894 = vmatprep.subr.mxu0 %v5059_v2  ;;  %4890 = vmatpush3.msk.msra.mxu1 %vm3570_vm4, %v3560_v32 }
 0x326   : > { %4899 = vmatprep.subr.mxu1 %v5059_v2 }
 0x3c4   : > { %v3044_v34 = vpop.f32.mrf.mxu0 }
 0x3c5   : > { %4887 = vmatmul.mubr.msk.f32.vlgmr.msra.gmra.mxu0 %vm2277_vm2, %v3044_v34 }
 0x3c6   : > { %v4848_v35 = vpop.f32.mrf.mxu0  ;;  %4895 = vmatpush3.msk.msra.mxu0 %vm3570_vm4, %v3561_v33  ;;  %4896 = vmatprep.mubr.msk.f32.mxu0 %vm5060_vm1, %v5059_v2 }
 0x3c7   : > { %4904 = vmatprep.subr.mxu0 %v5059_v2 }
 0x3c8   : > { %v3117_v37 = vpop.f32.mrf.mxu1 }
 0x3c9   : > { %4892 = vmatmul.mubr.msk.f32.vlgmr.msra.gmra.mxu1 %vm2277_vm2, %v3117_v37 }
 0x3ca   : > { %v4853_v38 = vpop.f32.mrf.mxu1  ;;  %4900 = vmatpush3.msk.msra.mxu1 %vm3570_vm4, %v3562_v36  ;;  %4901 = vmatprep.mubr.msk.f32.mxu1 %vm5060_vm1, %v5059_v2 }
 0x3cb   : > { %4909 = vmatprep.subr.mxu1 %v5059_v2 }
 0x3ce   : > { %v3190_v40 = vpop.f32.mrf.mxu0 }
 0x3cf   : > { %4897 = vmatmul.mubr.msk.f32.vlgmr.msra.gmra.mxu0 %vm2277_vm2, %v3190_v40 }
 0x3d0   : > { %v4858_v41 = vpop.f32.mrf.mxu0  ;;  %4905 = vmatpush3.msk.msra.mxu0 %vm3570_vm4, %v3563_v39  ;;  %4906 = vmatprep.mubr.msk.f32.mxu0 %vm5060_vm1, %v5059_v2 }
 0x3d1   : > { %4914 = vmatprep.subr.mxu0 %v5059_v2 }
 0x3d2   : > { %v3263_v43 = vpop.f32.mrf.mxu1 }
 0x3d3   : > { %4902 = vmatmul.mubr.msk.f32.vlgmr.msra.gmra.mxu1 %vm2277_vm2, %v3263_v43 }
 0x3d4   : > { %v4863_v44 = vpop.f32.mrf.mxu1  ;;  %4910 = vmatpush3.msk.msra.mxu1 %vm3570_vm4, %v3564_v42  ;;  %4911 = vmatprep.mubr.msk.f32.mxu1 %vm5060_vm1, %v5059_v2 }
 0x3d5   : > { %4919 = vmatprep.subr.mxu1 %v5059_v2 }
 0x3d8   : > { %v3409_v47 = vpop.f32.mrf.mxu1 }
 0x3d9   : > { %v3336_v51 = vpop.f32.mrf.mxu0  ;;  %4912 = vmatmul.mubr.msk.f32.vlgmr.msra.gmra.mxu1 %vm2277_vm2, %v3409_v47 }
 0x3da   : > { %4907 = vmatmul.mubr.msk.f32.vlgmr.msra.gmra.mxu0 %vm2277_vm2, %v3336_v51  ;;  %v4873_v54 = vpop.f32.mrf.mxu1  ;;  %4920 = vmatpush3.msk.msra.mxu1 %vm3570_vm4, %v3566_v46 }
 0x3db   : > { %v4868_v55 = vpop.f32.mrf.mxu0  ;;  %4915 = vmatpush3.msk.msra.mxu0 %vm3570_vm4, %v3565_v50  ;;  %4916 = vmatprep.mubr.msk.f32.mxu0 %vm5060_vm1, %v5059_v2 }
 0x3dc   : > { %4921 = vmatprep.mubr.msk.f32.mxu1 %vm5060_vm1, %v5059_v2 }
 0x3e2   : > { %v3555_v56 = vpop.f32.mrf.mxu1 }
 0x3e3   : > { %v3482_v57 = vpop.f32.mrf.mxu0  ;;  %4922 = vmatmul.mubr.msk.f32.vlgmr.msra.gmra.mxu1 %vm2277_vm2, %v3555_v56 }
 0x3e4   : > { %4917 = vmatmul.mubr.msk.f32.vlgmr.msra.gmra.mxu0 %vm2277_vm2, %v3482_v57  ;;  %v4883_v58 = vpop.f32.mrf.mxu1 }
 0x3e5   : > { %v4878_v59 = vpop.f32.mrf.mxu0 }
 0x485   : > { %v3640_v60 = vpop.f32.mrf.mxu0 }
 0x486   : > { %v4176_v2 = vsel %vm417_vm0, %v3640_v60, 0.0 }
 0x487   : > { %v4888_v61 = vpop.f32.mrf.mxu0 }
 0x489   : > { %v3716_v62 = vpop.f32.mrf.mxu1 }
 0x48a   : > { %v4177_v5 = vsel %vm417_vm0, %v3716_v62, 0.0 }
 0x48b   : > { %v4893_v63 = vpop.f32.mrf.mxu1  ;;  %v4178_v8 = vadd.f32 %v4177_v5, %v4176_v2 }
 0x48f   : > { %v3792_v0 = vpop.f32.mrf.mxu0 }
 0x490   : > { %v4179_v6 = vsel %vm417_vm0, %v3792_v0, 0.0 }
 0x491   : > { %v4898_v1 = vpop.f32.mrf.mxu0  ;;  %v4180_v13 = vadd.f32 %v4179_v6, %v4178_v8 }
 0x493   : > { %v3868_v3 = vpop.f32.mrf.mxu1 }
 0x494   : > { %v4181_v11 = vsel %vm417_vm0, %v3868_v3, 0.0 }
 0x495   : > { %v4903_v4 = vpop.f32.mrf.mxu1  ;;  %v4182_v15 = vadd.f32 %v4181_v11, %v4180_v13 }
 0x499   : > { %v4020_v7 = vpop.f32.mrf.mxu1 }
 0x49a   : > { %v3944_v10 = vpop.f32.mrf.mxu0  ;;  %v4185_v45 = vsel %vm417_vm0, %v4020_v7, 0.0 }
 0x49b   : > { %v4913_v12 = vpop.f32.mrf.mxu1  ;;  %v4183_v9 = vsel %vm417_vm0, %v3944_v10, 0.0 }
 0x49c   : > { %v4908_v14 = vpop.f32.mrf.mxu0  ;;  %v4184_v16 = vadd.f32 %v4183_v9, %v4182_v15 }
 0x49e   : > { %v4186_v18 = vadd.f32 %v4185_v45, %v4184_v16 }
 0x4a3   : > { %v4172_v17 = vpop.f32.mrf.mxu1 }
 0x4a4   : > { %v4096_v19 = vpop.f32.mrf.mxu0  ;;  %v4189_v23 = vsel %vm417_vm0, %v4172_v17, 0.0 }
 0x4a5   : > { %v4187_v20 = vsel %vm417_vm0, %v4096_v19, 0.0  ;;  %v4923_v21 = vpop.f32.mrf.mxu1 }
 0x4a6   : > { %v4188_v22 = vadd.f32 %v4187_v20, %v4186_v18  ;;  %v4918_v48 = vpop.f32.mrf.mxu0 }
 0x4a8   : > { %v4190_v24 = vadd.f32 %v4189_v23, %v4188_v22 }
 0x4aa   : > { %v4198_v25 = vadd.f32 %v4367_v49, %v4190_v24 }
 0x4ac   : > { %4199 = vst.msk [vmem:[%s323_s23] sm:$0xff] %vm417_vm0, %v4198_v25 }
 0x4ad   : > { %5010 = shalt.err (!%p5007_p3)
}
 0x4ae   : > { %s5011_s16 = scalar_lea.hbm %s4212_s27, 128  ;;  %s5015_s23 = scalar_lea.hbm %s5966_s9, 256 }
 0x4af   : > { %p5012_p4 = scmp.ne.s32.totalorder %s4212_s27, %s5011_s16  ;;  %p5016_p9 = scmp.lt.s32.totalorder %s4212_s27, %s5966_s9 }
 0x4b0   : > { %p5017_p10 = scmp.lt.s32.totalorder %s5015_s23, %s5011_s16 }
 0x4b1   : > { %p5013_p7 = pnand %p5012_p4, %p5150_p5 }
 0x4b2   : > { %p5018_p11 = por %p5017_p10, %p5016_p9 }
 0x4b3   : > { %p5014_p8 = pneg %p5013_p7 }
 0x4b5   : > { %p5019_p12 = pnand %p5018_p11, %p5014_p8 }
 0x4b7   : > { %5022 = shalt.err (!%p5019_p12)
}
 0x4b8   : > { %4924 = dma.vmem_to_hbm [thread:$0]  (%p5150_p5), %s4215_s24, 128, %s4212_s27, %s4201_s28  }
 0x4b9 PF: > { %p4930_p13 = scmp.ge.s32.totalorder %s5057_s12, 2  ;;  %s4226_s14 = sand.u32 1, %s5045_s30  }
 0x4ba   : > { %s4227_s17 = scalar_lea.sflag [#allocation3], %s4226_s14 }
 0x4bb   : > { %p4927_p0 = pnand %p4930_p13, %p5154_p6 }
 0x4bd   : > { %p4928_p1 = pneg %p4927_p0 }
 0x4bf   : > { %5040 = dma.done.wait (%p4928_p1), %s4227_s17, 128  }
 0x4c0   : > { %5042 = vsyncadd (%p4928_p1), %s4227_s17, 4294967168  ;;  %p19_p2 = scmp.ge.s32.totalorder %s5137_s15, 4   ;;  %s5969_s30 = smov %s5049_s10 }
 0x4c1   : > { %s5970_s10 = smov %s5053_s11  ;;  %s5971_s11 = smov %s5148_s18 }
 0x4c2   : > { %s5972_s12 = smov %s5137_s15  ;;  %21 = sbr.rel (!%p19_p2) target bundleno = 3 (0x3), region = 91 }
 0x4c7   :  { %4232 = vsyncpa [#allocation3], 1 }
 0x4c8   :  { %4234 = vsyncpa [#allocation3 + $0x1], 1 }

</bundles_post_ra>
